<compile_context>
chip_gen: v7x
topology: tpu7x:2x2x1
jax: 0.10.0
libtpu: 0.0.40
codegen_flags: <defaults>
</compile_context>

<pallas_src>
import functools

import jax
import jax.numpy as jnp
from jax.experimental import pallas as pl
from jax.experimental.pallas import tpu as pltpu


def _round_up(x: int, m: int) -> int:
    return ((x + m - 1) // m) * m


# ---------------------------------------------------------------------------
# Fused actor + critic kernel (one row-tile per grid step)
# ---------------------------------------------------------------------------
def _make_fused_kernel(n_agents: int):
    def kernel(obs_ref, ids_ref, avail_ref,
               wa_rep_ref, ba_rep_ref, wa1_ref, wa1i_ref, ba1_ref, wa2_ref, ba2_ref,
               wc_rep_ref, bc_rep_ref, wc1_ref, wc1i_ref, bc1_ref, wc2_ref, bc2_ref,
               logits_ref, values_ref):
        obs = obs_ref[...]                                # (T, obs_dim)  bf16
        ids = ids_ref[...].astype(jnp.float32)            # (T, n_agents) one-hot

        def ids_bias(wi_ref):
            # one-hot ids => row-select of wi.  Done on the VPU as an unrolled
            # broadcast-multiply (no MXU push for a K=n_agents matmul).
            acc = ids[:, 0:1] * wi_ref[0:1, :].astype(jnp.float32)
            for a in range(1, n_agents):
                acc = acc + ids[:, a:a + 1] * wi_ref[a:a + 1, :].astype(jnp.float32)
            return acc                                    # (T, H) f32

        # ------------------------- actor path -------------------------
        sa = jnp.dot(obs, wa_rep_ref[...], preferred_element_type=jnp.float32)
        sa = jnp.maximum(sa + ba_rep_ref[...], 0.0)
        ha = jnp.dot(sa.astype(jnp.bfloat16), wa1_ref[...],
                     preferred_element_type=jnp.float32)
        ha = jnp.maximum(ha + ids_bias(wa1i_ref) + ba1_ref[...], 0.0)
        logits = jnp.dot(ha.astype(jnp.bfloat16), wa2_ref[...],
                         preferred_element_type=jnp.float32) + ba2_ref[...]
        logits_ref[...] = jnp.where(avail_ref[...] > 0, logits, jnp.float32(-1e10))

        # ------------------------- critic path ------------------------
        sc = jnp.dot(obs, wc_rep_ref[...], preferred_element_type=jnp.float32)
        sc = jnp.maximum(sc + bc_rep_ref[...], 0.0)
        hc = jnp.dot(sc.astype(jnp.bfloat16), wc1_ref[...],
                     preferred_element_type=jnp.float32)
        hc = jnp.maximum(hc + ids_bias(wc1i_ref) + bc1_ref[...], 0.0)
        # final (H, 1) matmul -> lane reduction instead of an N=1 MXU matmul.
        v = jnp.sum(hc * wc2_ref[...].astype(jnp.float32), axis=-1, keepdims=True)
        values_ref[...] = v + bc2_ref[...]

    return kernel


# ---------------------------------------------------------------------------
# Wrapper: tiling, padding, pallas_call
# ---------------------------------------------------------------------------
def maac_fused_forward(params, obs, ids, avail, *, tile_b: int = 1024):
    """Returns (logits, values) for all rows (rows = batch * n_agents)."""
    B, obs_dim = obs.shape
    n_agents = ids.shape[1]
    n_actions = avail.shape[1]
    rep_a = params["w_rep_a"].shape[1]
    rep_c = params["w_rep_c"].shape[1]
    hid_a = params["w_a1_s"].shape[1]
    hid_c = params["w_c1_s"].shape[1]

    # Row tile: multiple of 8 (sublane), capped by the requested tile size.
    tb = min(_round_up(tile_b, 8), _round_up(B, 8))
    Bp = _round_up(B, tb)
    pad = Bp - B

    obs_p = jnp.pad(obs.astype(jnp.bfloat16), ((0, pad), (0, 0)))
    ids_p = jnp.pad(ids.astype(jnp.bfloat16), ((0, pad), (0, 0)))
    avail_p = jnp.pad(avail.astype(jnp.bfloat16), ((0, pad), (0, 0)))

    weights = (params["w_rep_a"], params["b_rep_a"],
               params["w_a1_s"], params["w_a1_i"], params["b_a1"],
               params["w_a2"], params["b_a2"],
               params["w_rep_c"], params["b_rep_c"],
               params["w_c1_s"], params["w_c1_i"], params["b_c1"],
               params["w_c2_row"], params["b_c2"])

    def row_spec(d):
        return pl.BlockSpec((tb, d), lambda i: (i, 0))

    def resident_spec(shape):
        # Same block for every grid step -> stays VMEM-resident, no re-fetch.
        return pl.BlockSpec(tuple(shape), lambda i: (0, 0))

    in_specs = ([row_spec(obs_dim), row_spec(n_agents), row_spec(n_actions)]
                + [resident_spec(w.shape) for w in weights])
    out_specs = [pl.BlockSpec((tb, n_actions), lambda i: (i, 0)),
                 pl.BlockSpec((tb, 1), lambda i: (i, 0))]

    flops = 2 * Bp * (obs_dim * rep_a + rep_a * hid_a + hid_a * n_actions
                      + obs_dim * rep_c + rep_c * hid_c + hid_c)
    bytes_in = ((obs_p.size + ids_p.size + avail_p.size) * 2
                + sum(int(w.size) * w.dtype.itemsize for w in weights))
    bytes_out = Bp * (n_actions + 1) * 4

    grid_spec = pltpu.PrefetchScalarGridSpec(
        num_scalar_prefetch=0,
        grid=(Bp // tb,),
        in_specs=in_specs,
        out_specs=out_specs,
    )

    logits_p, values_p = pl.pallas_call(
        _make_fused_kernel(n_agents),
        out_shape=(jax.ShapeDtypeStruct((Bp, n_actions), jnp.float32),
                   jax.ShapeDtypeStruct((Bp, 1), jnp.float32)),
        grid_spec=grid_spec,
        compiler_params=pltpu.CompilerParams(
            dimension_semantics=("parallel",),          # shard row tiles across TCs
            vmem_limit_bytes=32 * 1024 * 1024),         # explicit budget (v7x-safe)
        cost_estimate=pl.CostEstimate(flops=flops, transcendentals=0,
                                      bytes_accessed=bytes_in + bytes_out),
    )(obs_p, ids_p, avail_p, *weights)

    return logits_p[:B], values_p[:B]


# ---------------------------------------------------------------------------
# MAAC_Policy (JAX/Pallas, parameter sharing, no RNN)
# ---------------------------------------------------------------------------
class MAACPolicyPallas:
    def __init__(self, obs_dim, rep_dim, actor_hidden, critic_hidden,
                 n_actions, n_agents, key, tile_b=1024):
        self.n_agents = n_agents
        self.n_actions = n_actions
        ks = jax.random.split(key, 14)

        def w(k, shape, scale=0.1, dtype=jnp.bfloat16):
            return (scale * jax.random.normal(k, shape)).astype(dtype)

        self.params = {
            # actor representation (Basic_MLP: obs -> rep, ReLU)
            "w_rep_a": w(ks[0], (obs_dim, rep_dim)),
            "b_rep_a": w(ks[1], (1, rep_dim), dtype=jnp.float32),
            # actor hidden (split concat: state part + one-hot-agent part)
            "w_a1_s": w(ks[2], (rep_dim, actor_hidden)),
            "w_a1_i": w(ks[3], (n_agents, actor_hidden)),
            "b_a1": w(ks[4], (1, actor_hidden), dtype=jnp.float32),
            # actor output -> logits
            "w_a2": w(ks[5], (actor_hidden, n_actions)),
            "b_a2": w(ks[6], (1, n_actions), dtype=jnp.float32),
            # critic representation
            "w_rep_c": w(ks[7], (obs_dim, rep_dim)),
            "b_rep_c": w(ks[8], (1, rep_dim), dtype=jnp.float32),
            # critic hidden (split concat)
            "w_c1_s": w(ks[9], (rep_dim, critic_hidden)),
            "w_c1_i": w(ks[10], (n_agents, critic_hidden)),
            "b_c1": w(ks[11], (1, critic_hidden), dtype=jnp.float32),
            # critic output stored as a (1, hidden) row => lane reduce in-kernel
            "w_c2_row": w(ks[12], (1, critic_hidden)),
            "b_c2": w(ks[13], (1, 1), dtype=jnp.float32),
        }
        self._fused = jax.jit(functools.partial(maac_fused_forward, tile_b=tile_b))

    # fused entry point (actor + critic in one kernel launch)
    def forward_get_values(self, observation, agent_ids, avail_actions=None):
        if avail_actions is None:
            avail_actions = jnp.ones((observation.shape[0], self.n_actions),
                                     jnp.float32)
        logits, values = self._fused(self.params, observation, agent_ids,
                                     avail_actions)
        rnn_hidden_new = [None, None]   # use_rnn=False
        return rnn_hidden_new, logits, values

    def forward(self, observation, agent_ids, avail_actions=None):
        """Mirrors MAAC_Policy.forward: returns (rnn_hidden_new, pi_logits)."""
        rnn_hidden_new, logits, _ = self.forward_get_values(
            observation, agent_ids, avail_actions)
        return rnn_hidden_new, logits

    def get_values(self, observation, agent_ids):
        """Mirrors MAAC_Policy.get_values: returns (rnn_hidden_new, values)."""
        rnn_hidden_new, _, values = self.forward_get_values(observation, agent_ids)
        return rnn_hidden_new, values

    def value_tot(self, values_n):
        # VDN mixer: sum individual values over the agent axis.
        # TODO(synk): trivial reduction kept as plain-JAX glue, not a Pallas kernel.
        return jnp.sum(values_n, axis=1)


# ---------------------------------------------------------------------------
# Pure-JAX reference (f32) for a correctness sanity check
# ---------------------------------------------------------------------------
def _reference(params, obs, ids, avail):
    f = lambda x: x.astype(jnp.float32)
    sa = jax.nn.relu(obs @ f(params["w_rep_a"]) + params["b_rep_a"])
    ha = jax.nn.relu(sa @ f(params["w_a1_s"]) + ids @ f(params["w_a1_i"])
                     + params["b_a1"])
    logits = ha @ f(params["w_a2"]) + params["b_a2"]
    logits = jnp.where(avail > 0, logits, jnp.float32(-1e10))
    sc = jax.nn.relu(obs @ f(params["w_rep_c"]) + params["b_rep_c"])
    hc = jax.nn.relu(sc @ f(params["w_c1_s"]) + ids @ f(params["w_c1_i"])
                     + params["b_c1"])
    v = hc @ f(params["w_c2_row"]).T + params["b_c2"]
    return logits, v


# ---------------------------------------------------------------------------
if __name__ == "__main__":
    batch, n_agents = 2, 3
    obs_dim, rep_dim, actor_hidden, critic_hidden, n_actions = 16, 32, 32, 32, 8
    B = batch * n_agents

    key = jax.random.PRNGKey(0)
    k_obs, k_param = jax.random.split(key, 2)

    policy = MAACPolicyPallas(obs_dim, rep_dim, actor_hidden, critic_hidden,
                              n_actions, n_agents, k_param)

    # observations flattened to (batch * n_agents, obs_dim) for parameter sharing
    obs = jax.random.normal(k_obs, (B, obs_dim), jnp.float32)
    # one-hot agent ids, tiled per batch element
    agent_ids = jnp.tile(jnp.eye(n_agents, dtype=jnp.float32), (batch, 1))
    # availability mask with some actions masked out (deterministic pattern)
    avail = jnp.ones((B, n_actions), jnp.float32)
    avail = avail.at[:, n_actions - 1].set(0.0)
    avail = avail.at[0, 2].set(0.0)

    # fused actor+critic kernel
    _, logits, values = policy.forward_get_values(obs, agent_ids, avail)
    v_tot = policy.value_tot(values.reshape(batch, n_agents))
    jax.block_until_ready((logits, values, v_tot))

    assert logits.shape == (B, n_actions)
    assert values.shape == (B, 1)
    assert v_tot.shape == (batch,)

    # API-parity wrappers (same fused kernel underneath)
    _, logits_fw = policy.forward(obs, agent_ids, avail)
    _, values_gv = policy.get_values(obs, agent_ids)
    jax.block_until_ready((logits_fw, values_gv))
    assert logits_fw.shape == (B, n_actions) and values_gv.shape == (B, 1)

    # correctness check vs f32 reference (inputs rounded to bf16 like the kernel)
    bround = lambda x: x.astype(jnp.bfloat16).astype(jnp.float32)
    ref_logits, ref_values = _reference(policy.params, bround(obs),
                                        bround(agent_ids), avail)
    assert jnp.allclose(logits, ref_logits, atol=5e-2, rtol=5e-2)
    assert jnp.allclose(values, ref_values, atol=5e-2, rtol=5e-2)

    print("KERNEL_OK")
</pallas_src>

<mosaic_0001>
module attributes {stable_mosaic.version = 11 : i64} {
  func.func @kernel(%arg0: i32, %arg1: memref<8x16xbf16, #tpu.memory_space<vmem>>, %arg2: memref<8x3xbf16, #tpu.memory_space<vmem>>, %arg3: memref<8x8xbf16, #tpu.memory_space<vmem>>, %arg4: memref<16x32xbf16, #tpu.memory_space<vmem>>, %arg5: memref<1x32xf32, #tpu.memory_space<vmem>>, %arg6: memref<32x32xbf16, #tpu.memory_space<vmem>>, %arg7: memref<3x32xbf16, #tpu.memory_space<vmem>>, %arg8: memref<1x32xf32, #tpu.memory_space<vmem>>, %arg9: memref<32x8xbf16, #tpu.memory_space<vmem>>, %arg10: memref<1x8xf32, #tpu.memory_space<vmem>>, %arg11: memref<16x32xbf16, #tpu.memory_space<vmem>>, %arg12: memref<1x32xf32, #tpu.memory_space<vmem>>, %arg13: memref<32x32xbf16, #tpu.memory_space<vmem>>, %arg14: memref<3x32xbf16, #tpu.memory_space<vmem>>, %arg15: memref<1x32xf32, #tpu.memory_space<vmem>>, %arg16: memref<1x32xbf16, #tpu.memory_space<vmem>>, %arg17: memref<1x1xf32, #tpu.memory_space<vmem>>, %arg18: memref<8x8xf32, #tpu.memory_space<vmem>>, %arg19: memref<8x1xf32, #tpu.memory_space<vmem>>) attributes {dimension_semantics = [#tpu.dimension_semantics<parallel>], iteration_bounds = array<i64: 1>, scalar_prefetch = 0 : i64, scratch_operands = 0 : i64, tpu.core_type = #tpu.core_type<tc>, window_params = [{transform_indices = @transform_0, window_bounds = array<i64: 8, 16>}, {transform_indices = @transform_1, window_bounds = array<i64: 8, 3>}, {transform_indices = @transform_2, window_bounds = array<i64: 8, 8>}, {pipeline_mode = #tpu.pipeline_mode<synchronous>, transform_indices = @transform_3, window_bounds = array<i64: 16, 32>}, {pipeline_mode = #tpu.pipeline_mode<synchronous>, transform_indices = @transform_4, window_bounds = array<i64: 1, 32>}, {pipeline_mode = #tpu.pipeline_mode<synchronous>, transform_indices = @transform_5, window_bounds = array<i64: 32, 32>}, {pipeline_mode = #tpu.pipeline_mode<synchronous>, transform_indices = @transform_6, window_bounds = array<i64: 3, 32>}, {pipeline_mode = #tpu.pipeline_mode<synchronous>, transform_indices = @transform_7, window_bounds = array<i64: 1, 32>}, {pipeline_mode = #tpu.pipeline_mode<synchronous>, transform_indices = @transform_8, window_bounds = array<i64: 32, 8>}, {pipeline_mode = #tpu.pipeline_mode<synchronous>, transform_indices = @transform_9, window_bounds = array<i64: 1, 8>}, {pipeline_mode = #tpu.pipeline_mode<synchronous>, transform_indices = @transform_10, window_bounds = array<i64: 16, 32>}, {pipeline_mode = #tpu.pipeline_mode<synchronous>, transform_indices = @transform_11, window_bounds = array<i64: 1, 32>}, {pipeline_mode = #tpu.pipeline_mode<synchronous>, transform_indices = @transform_12, window_bounds = array<i64: 32, 32>}, {pipeline_mode = #tpu.pipeline_mode<synchronous>, transform_indices = @transform_13, window_bounds = array<i64: 3, 32>}, {pipeline_mode = #tpu.pipeline_mode<synchronous>, transform_indices = @transform_14, window_bounds = array<i64: 1, 32>}, {pipeline_mode = #tpu.pipeline_mode<synchronous>, transform_indices = @transform_15, window_bounds = array<i64: 1, 32>}, {pipeline_mode = #tpu.pipeline_mode<synchronous>, transform_indices = @transform_16, window_bounds = array<i64: 1, 1>}, {transform_indices = @transform_17, window_bounds = array<i64: 8, 8>}, {transform_indices = @transform_18, window_bounds = array<i64: 8, 1>}]} {
    %c0 = arith.constant 0 : index
    %c0_0 = arith.constant 0 : index
    %0 = vector.load %arg1[%c0, %c0_0] : memref<8x16xbf16, #tpu.memory_space<vmem>>, vector<8x16xbf16>
    %c0_1 = arith.constant 0 : index
    %c0_2 = arith.constant 0 : index
    %1 = vector.load %arg2[%c0_1, %c0_2] : memref<8x3xbf16, #tpu.memory_space<vmem>>, vector<8x3xbf16>
    %2 = arith.extf %1 : vector<8x3xbf16> to vector<8x3xf32>
    %c0_3 = arith.constant 0 : index
    %c0_4 = arith.constant 0 : index
    %3 = vector.load %arg4[%c0_3, %c0_4] : memref<16x32xbf16, #tpu.memory_space<vmem>>, vector<16x32xbf16>
    %cst = arith.constant dense<0.000000e+00> : vector<8x32xf32>
    %4 = tpu.matmul %0, %3, %cst {dimension_numbers = #tpu.dot_dimension_numbers<[1], [0], [0], [1], [0, 0, 1, 1], [], []>} : vector<8x16xbf16>, vector<16x32xbf16>, vector<8x32xf32> -> vector<8x32xf32>
    %c0_5 = arith.constant 0 : index
    %c0_6 = arith.constant 0 : index
    %5 = vector.load %arg5[%c0_5, %c0_6] : memref<1x32xf32, #tpu.memory_space<vmem>>, vector<1x32xf32>
    %6 = vector.broadcast %5 : vector<1x32xf32> to vector<8x32xf32>
    %7 = arith.addf %4, %6 : vector<8x32xf32>
    %cst_7 = arith.constant 0.000000e+00 : f32
    %8 = vector.broadcast %cst_7 : f32 to vector<8x32xf32>
    %9 = arith.maximumf %7, %8 : vector<8x32xf32>
    %10 = arith.truncf %9 : vector<8x32xf32> to vector<8x32xbf16>
    %c0_8 = arith.constant 0 : index
    %c0_9 = arith.constant 0 : index
    %11 = vector.load %arg6[%c0_8, %c0_9] : memref<32x32xbf16, #tpu.memory_space<vmem>>, vector<32x32xbf16>
    %cst_10 = arith.constant dense<0.000000e+00> : vector<8x32xf32>
    %12 = tpu.matmul %10, %11, %cst_10 {dimension_numbers = #tpu.dot_dimension_numbers<[1], [0], [0], [1], [0, 0, 1, 1], [], []>} : vector<8x32xbf16>, vector<32x32xbf16>, vector<8x32xf32> -> vector<8x32xf32>
    %13 = vector.extract_strided_slice %2 {offsets = [0, 0], sizes = [8, 1], strides = [1, 1]} : vector<8x3xf32> to vector<8x1xf32>
    %c0_11 = arith.constant 0 : index
    %c0_12 = arith.constant 0 : index
    %14 = vector.load %arg7[%c0_11, %c0_12] : memref<3x32xbf16, #tpu.memory_space<vmem>>, vector<1x32xbf16>
    %15 = arith.extf %14 : vector<1x32xbf16> to vector<1x32xf32>
    %16 = vector.broadcast %13 : vector<8x1xf32> to vector<8x32xf32>
    %17 = vector.broadcast %15 : vector<1x32xf32> to vector<8x32xf32>
    %18 = arith.mulf %16, %17 : vector<8x32xf32>
    %19 = vector.extract_strided_slice %2 {offsets = [0, 1], sizes = [8, 1], strides = [1, 1]} : vector<8x3xf32> to vector<8x1xf32>
    %c1 = arith.constant 1 : index
    %c0_13 = arith.constant 0 : index
    %20 = vector.load %arg7[%c1, %c0_13] : memref<3x32xbf16, #tpu.memory_space<vmem>>, vector<1x32xbf16>
    %21 = arith.extf %20 : vector<1x32xbf16> to vector<1x32xf32>
    %22 = vector.broadcast %19 : vector<8x1xf32> to vector<8x32xf32>
    %23 = vector.broadcast %21 : vector<1x32xf32> to vector<8x32xf32>
    %24 = arith.mulf %22, %23 : vector<8x32xf32>
    %25 = arith.addf %18, %24 : vector<8x32xf32>
    %26 = vector.extract_strided_slice %2 {offsets = [0, 2], sizes = [8, 1], strides = [1, 1]} : vector<8x3xf32> to vector<8x1xf32>
    %c2 = arith.constant 2 : index
    %c0_14 = arith.constant 0 : index
    %27 = vector.load %arg7[%c2, %c0_14] : memref<3x32xbf16, #tpu.memory_space<vmem>>, vector<1x32xbf16>
    %28 = arith.extf %27 : vector<1x32xbf16> to vector<1x32xf32>
    %29 = vector.broadcast %26 : vector<8x1xf32> to vector<8x32xf32>
    %30 = vector.broadcast %28 : vector<1x32xf32> to vector<8x32xf32>
    %31 = arith.mulf %29, %30 : vector<8x32xf32>
    %32 = arith.addf %25, %31 : vector<8x32xf32>
    %33 = arith.addf %12, %32 : vector<8x32xf32>
    %c0_15 = arith.constant 0 : index
    %c0_16 = arith.constant 0 : index
    %34 = vector.load %arg8[%c0_15, %c0_16] : memref<1x32xf32, #tpu.memory_space<vmem>>, vector<1x32xf32>
    %35 = vector.broadcast %34 : vector<1x32xf32> to vector<8x32xf32>
    %36 = arith.addf %33, %35 : vector<8x32xf32>
    %cst_17 = arith.constant 0.000000e+00 : f32
    %37 = vector.broadcast %cst_17 : f32 to vector<8x32xf32>
    %38 = arith.maximumf %36, %37 : vector<8x32xf32>
    %39 = arith.truncf %38 : vector<8x32xf32> to vector<8x32xbf16>
    %c0_18 = arith.constant 0 : index
    %c0_19 = arith.constant 0 : index
    %40 = vector.load %arg9[%c0_18, %c0_19] : memref<32x8xbf16, #tpu.memory_space<vmem>>, vector<32x8xbf16>
    %cst_20 = arith.constant dense<0.000000e+00> : vector<8x8xf32>
    %41 = tpu.matmul %39, %40, %cst_20 {dimension_numbers = #tpu.dot_dimension_numbers<[1], [0], [0], [1], [0, 0, 1, 1], [], []>} : vector<8x32xbf16>, vector<32x8xbf16>, vector<8x8xf32> -> vector<8x8xf32>
    %c0_21 = arith.constant 0 : index
    %c0_22 = arith.constant 0 : index
    %42 = vector.load %arg10[%c0_21, %c0_22] : memref<1x8xf32, #tpu.memory_space<vmem>>, vector<1x8xf32>
    %43 = vector.broadcast %42 : vector<1x8xf32> to vector<8x8xf32>
    %44 = arith.addf %41, %43 : vector<8x8xf32>
    %c0_23 = arith.constant 0 : index
    %c0_24 = arith.constant 0 : index
    %45 = vector.load %arg3[%c0_23, %c0_24] : memref<8x8xbf16, #tpu.memory_space<vmem>>, vector<8x8xbf16>
    %cst_25 = arith.constant 0.000000e+00 : bf16
    %46 = vector.broadcast %cst_25 : bf16 to vector<8x8xbf16>
    %47 = arith.cmpf ogt, %45, %46 : vector<8x8xbf16>
    %cst_26 = arith.constant -1.000000e+10 : f32
    %48 = vector.broadcast %cst_26 : f32 to vector<8x8xf32>
    %49 = arith.select %47, %44, %48 : vector<8x8xi1>, vector<8x8xf32>
    %c0_27 = arith.constant 0 : index
    %c0_28 = arith.constant 0 : index
    %50 = vector.load %arg18[%c0_27, %c0_28] : memref<8x8xf32, #tpu.memory_space<vmem>>, vector<8x8xf32>
    tpu.vector_store %arg18[%c0_27, %c0_28], %49 {strides = array<i32>} : memref<8x8xf32, #tpu.memory_space<vmem>>, vector<8x8xf32>,
    %c0_29 = arith.constant 0 : index
    %c0_30 = arith.constant 0 : index
    %51 = vector.load %arg11[%c0_29, %c0_30] : memref<16x32xbf16, #tpu.memory_space<vmem>>, vector<16x32xbf16>
    %cst_31 = arith.constant dense<0.000000e+00> : vector<8x32xf32>
    %52 = tpu.matmul %0, %51, %cst_31 {dimension_numbers = #tpu.dot_dimension_numbers<[1], [0], [0], [1], [0, 0, 1, 1], [], []>} : vector<8x16xbf16>, vector<16x32xbf16>, vector<8x32xf32> -> vector<8x32xf32>
    %c0_32 = arith.constant 0 : index
    %c0_33 = arith.constant 0 : index
    %53 = vector.load %arg12[%c0_32, %c0_33] : memref<1x32xf32, #tpu.memory_space<vmem>>, vector<1x32xf32>
    %54 = vector.broadcast %53 : vector<1x32xf32> to vector<8x32xf32>
    %55 = arith.addf %52, %54 : vector<8x32xf32>
    %cst_34 = arith.constant 0.000000e+00 : f32
    %56 = vector.broadcast %cst_34 : f32 to vector<8x32xf32>
    %57 = arith.maximumf %55, %56 : vector<8x32xf32>
    %58 = arith.truncf %57 : vector<8x32xf32> to vector<8x32xbf16>
    %c0_35 = arith.constant 0 : index
    %c0_36 = arith.constant 0 : index
    %59 = vector.load %arg13[%c0_35, %c0_36] : memref<32x32xbf16, #tpu.memory_space<vmem>>, vector<32x32xbf16>
    %cst_37 = arith.constant dense<0.000000e+00> : vector<8x32xf32>
    %60 = tpu.matmul %58, %59, %cst_37 {dimension_numbers = #tpu.dot_dimension_numbers<[1], [0], [0], [1], [0, 0, 1, 1], [], []>} : vector<8x32xbf16>, vector<32x32xbf16>, vector<8x32xf32> -> vector<8x32xf32>
    %61 = vector.extract_strided_slice %2 {offsets = [0, 0], sizes = [8, 1], strides = [1, 1]} : vector<8x3xf32> to vector<8x1xf32>
    %c0_38 = arith.constant 0 : index
    %c0_39 = arith.constant 0 : index
    %62 = vector.load %arg14[%c0_38, %c0_39] : memref<3x32xbf16, #tpu.memory_space<vmem>>, vector<1x32xbf16>
    %63 = arith.extf %62 : vector<1x32xbf16> to vector<1x32xf32>
    %64 = vector.broadcast %61 : vector<8x1xf32> to vector<8x32xf32>
    %65 = vector.broadcast %63 : vector<1x32xf32> to vector<8x32xf32>
    %66 = arith.mulf %64, %65 : vector<8x32xf32>
    %67 = vector.extract_strided_slice %2 {offsets = [0, 1], sizes = [8, 1], strides = [1, 1]} : vector<8x3xf32> to vector<8x1xf32>
    %c1_40 = arith.constant 1 : index
    %c0_41 = arith.constant 0 : index
    %68 = vector.load %arg14[%c1_40, %c0_41] : memref<3x32xbf16, #tpu.memory_space<vmem>>, vector<1x32xbf16>
    %69 = arith.extf %68 : vector<1x32xbf16> to vector<1x32xf32>
    %70 = vector.broadcast %67 : vector<8x1xf32> to vector<8x32xf32>
    %71 = vector.broadcast %69 : vector<1x32xf32> to vector<8x32xf32>
    %72 = arith.mulf %70, %71 : vector<8x32xf32>
    %73 = arith.addf %66, %72 : vector<8x32xf32>
    %74 = vector.extract_strided_slice %2 {offsets = [0, 2], sizes = [8, 1], strides = [1, 1]} : vector<8x3xf32> to vector<8x1xf32>
    %c2_42 = arith.constant 2 : index
    %c0_43 = arith.constant 0 : index
    %75 = vector.load %arg14[%c2_42, %c0_43] : memref<3x32xbf16, #tpu.memory_space<vmem>>, vector<1x32xbf16>
    %76 = arith.extf %75 : vector<1x32xbf16> to vector<1x32xf32>
    %77 = vector.broadcast %74 : vector<8x1xf32> to vector<8x32xf32>
    %78 = vector.broadcast %76 : vector<1x32xf32> to vector<8x32xf32>
    %79 = arith.mulf %77, %78 : vector<8x32xf32>
    %80 = arith.addf %73, %79 : vector<8x32xf32>
    %81 = arith.addf %60, %80 : vector<8x32xf32>
    %c0_44 = arith.constant 0 : index
    %c0_45 = arith.constant 0 : index
    %82 = vector.load %arg15[%c0_44, %c0_45] : memref<1x32xf32, #tpu.memory_space<vmem>>, vector<1x32xf32>
    %83 = vector.broadcast %82 : vector<1x32xf32> to vector<8x32xf32>
    %84 = arith.addf %81, %83 : vector<8x32xf32>
    %cst_46 = arith.constant 0.000000e+00 : f32
    %85 = vector.broadcast %cst_46 : f32 to vector<8x32xf32>
    %86 = arith.maximumf %84, %85 : vector<8x32xf32>
    %c0_47 = arith.constant 0 : index
    %c0_48 = arith.constant 0 : index
    %87 = vector.load %arg16[%c0_47, %c0_48] : memref<1x32xbf16, #tpu.memory_space<vmem>>, vector<1x32xbf16>
    %88 = arith.extf %87 : vector<1x32xbf16> to vector<1x32xf32>
    %89 = vector.broadcast %88 : vector<1x32xf32> to vector<8x32xf32>
    %90 = arith.mulf %86, %89 : vector<8x32xf32>
    %cst_49 = arith.constant dense<0.000000e+00> : vector<8xf32>
    %91 = vector.multi_reduction <add>, %90, %cst_49 [1] : vector<8x32xf32> to vector<8xf32>
    %92 = vector.shape_cast %91 : vector<8xf32> to vector<8x1xf32>
    %c0_50 = arith.constant 0 : index
    %c0_51 = arith.constant 0 : index
    %93 = vector.load %arg17[%c0_50, %c0_51] : memref<1x1xf32, #tpu.memory_space<vmem>>, vector<1x1xf32>
    %94 = vector.broadcast %93 : vector<1x1xf32> to vector<8x1xf32>
    %95 = arith.addf %92, %94 : vector<8x1xf32>
    %c0_52 = arith.constant 0 : index
    %c0_53 = arith.constant 0 : index
    %96 = vector.load %arg19[%c0_52, %c0_53] : memref<8x1xf32, #tpu.memory_space<vmem>>, vector<8x1xf32>
    tpu.vector_store %arg19[%c0_52, %c0_53], %95 {strides = array<i32>} : memref<8x1xf32, #tpu.memory_space<vmem>>, vector<8x1xf32>,
    return
  }
  func.func @transform_0(%arg0: i32) -> (i32, i32) {
    %c0_i32 = arith.constant 0 : i32
    %c0_i32_0 = arith.constant 0 : i32
    return %arg0, %c0_i32 : i32, i32
  }
  func.func @transform_1(%arg0: i32) -> (i32, i32) {
    %c0_i32 = arith.constant 0 : i32
    %c0_i32_0 = arith.constant 0 : i32
    return %arg0, %c0_i32 : i32, i32
  }
  func.func @transform_2(%arg0: i32) -> (i32, i32) {
    %c0_i32 = arith.constant 0 : i32
    %c0_i32_0 = arith.constant 0 : i32
    return %arg0, %c0_i32 : i32, i32
  }
  func.func @transform_3(%arg0: i32) -> (i32, i32) {
    %c0_i32 = arith.constant 0 : i32
    %c0_i32_0 = arith.constant 0 : i32
    %c0_i32_1 = arith.constant 0 : i32
    return %c0_i32, %c0_i32_0 : i32, i32
  }
  func.func @transform_4(%arg0: i32) -> (i32, i32) {
    %c0_i32 = arith.constant 0 : i32
    %c0_i32_0 = arith.constant 0 : i32
    %c0_i32_1 = arith.constant 0 : i32
    return %c0_i32, %c0_i32_0 : i32, i32
  }
  func.func @transform_5(%arg0: i32) -> (i32, i32) {
    %c0_i32 = arith.constant 0 : i32
    %c0_i32_0 = arith.constant 0 : i32
    %c0_i32_1 = arith.constant 0 : i32
    return %c0_i32, %c0_i32_0 : i32, i32
  }
  func.func @transform_6(%arg0: i32) -> (i32, i32) {
    %c0_i32 = arith.constant 0 : i32
    %c0_i32_0 = arith.constant 0 : i32
    %c0_i32_1 = arith.constant 0 : i32
    return %c0_i32, %c0_i32_0 : i32, i32
  }
  func.func @transform_7(%arg0: i32) -> (i32, i32) {
    %c0_i32 = arith.constant 0 : i32
    %c0_i32_0 = arith.constant 0 : i32
    %c0_i32_1 = arith.constant 0 : i32
    return %c0_i32, %c0_i32_0 : i32, i32
  }
  func.func @transform_8(%arg0: i32) -> (i32, i32) {
    %c0_i32 = arith.constant 0 : i32
    %c0_i32_0 = arith.constant 0 : i32
    %c0_i32_1 = arith.constant 0 : i32
    return %c0_i32, %c0_i32_0 : i32, i32
  }
  func.func @transform_9(%arg0: i32) -> (i32, i32) {
    %c0_i32 = arith.constant 0 : i32
    %c0_i32_0 = arith.constant 0 : i32
    %c0_i32_1 = arith.constant 0 : i32
    return %c0_i32, %c0_i32_0 : i32, i32
  }
  func.func @transform_10(%arg0: i32) -> (i32, i32) {
    %c0_i32 = arith.constant 0 : i32
    %c0_i32_0 = arith.constant 0 : i32
    %c0_i32_1 = arith.constant 0 : i32
    return %c0_i32, %c0_i32_0 : i32, i32
  }
  func.func @transform_11(%arg0: i32) -> (i32, i32) {
    %c0_i32 = arith.constant 0 : i32
    %c0_i32_0 = arith.constant 0 : i32
    %c0_i32_1 = arith.constant 0 : i32
    return %c0_i32, %c0_i32_0 : i32, i32
  }
  func.func @transform_12(%arg0: i32) -> (i32, i32) {
    %c0_i32 = arith.constant 0 : i32
    %c0_i32_0 = arith.constant 0 : i32
    %c0_i32_1 = arith.constant 0 : i32
    return %c0_i32, %c0_i32_0 : i32, i32
  }
  func.func @transform_13(%arg0: i32) -> (i32, i32) {
    %c0_i32 = arith.constant 0 : i32
    %c0_i32_0 = arith.constant 0 : i32
    %c0_i32_1 = arith.constant 0 : i32
    return %c0_i32, %c0_i32_0 : i32, i32
  }
  func.func @transform_14(%arg0: i32) -> (i32, i32) {
    %c0_i32 = arith.constant 0 : i32
    %c0_i32_0 = arith.constant 0 : i32
    %c0_i32_1 = arith.constant 0 : i32
    return %c0_i32, %c0_i32_0 : i32, i32
  }
  func.func @transform_15(%arg0: i32) -> (i32, i32) {
    %c0_i32 = arith.constant 0 : i32
    %c0_i32_0 = arith.constant 0 : i32
    %c0_i32_1 = arith.constant 0 : i32
    return %c0_i32, %c0_i32_0 : i32, i32
  }
  func.func @transform_16(%arg0: i32) -> (i32, i32) {
    %c0_i32 = arith.constant 0 : i32
    %c0_i32_0 = arith.constant 0 : i32
    %c0_i32_1 = arith.constant 0 : i32
    return %c0_i32, %c0_i32_0 : i32, i32
  }
  func.func @transform_17(%arg0: i32) -> (i32, i32) {
    %c0_i32 = arith.constant 0 : i32
    %c0_i32_0 = arith.constant 0 : i32
    return %arg0, %c0_i32 : i32, i32
  }
  func.func @transform_18(%arg0: i32) -> (i32, i32) {
    %c0_i32 = arith.constant 0 : i32
    %c0_i32_0 = arith.constant 0 : i32
    return %arg0, %c0_i32 : i32, i32
  }
}

</mosaic_0001>

<bundles_post_ra>
// kernel: maac_fused_forward.1
= control target key start
LH: loop header
LB: loop body
LE: loop exit
PB: predicated region body
PF: predicated region fallthrough
CT: control target
= control target key end

     0   :  { %s813_s0 = inlined_call_operand.vmem [shape: bf16[8,16], index: 0, kind: input, shape index: {}]   ;;  %s814_s1 = inlined_call_operand.vmem [shape: bf16[8,3], index: 1, kind: input, shape index: {}]   ;;  %s815_s2 = inlined_call_operand.vmem [shape: bf16[8,8], index: 2, kind: input, shape index: {}]   ;;  %s816_s3 = inlined_call_operand.vmem [shape: bf16[16,32], index: 3, kind: input, shape index: {}]   ;;  %s817_s4 = inlined_call_operand.vmem [shape: f32[1,32], index: 4, kind: input, shape index: {}]   ;;  %s818_s5 = inlined_call_operand.vmem [shape: bf16[32,32], index: 5, kind: input, shape index: {}]   ;;  %s819_s6 = inlined_call_operand.vmem [shape: bf16[3,32], index: 6, kind: input, shape index: {}]   ;;  %s820_s7 = inlined_call_operand.vmem [shape: f32[1,32], index: 7, kind: input, shape index: {}]   ;;  %s821_s8 = inlined_call_operand.vmem [shape: bf16[32,8], index: 8, kind: input, shape index: {}]   ;;  %s822_s9 = inlined_call_operand.vmem [shape: f32[1,8], index: 9, kind: input, shape index: {}]   ;;  %s823_s10 = inlined_call_operand.vmem [shape: bf16[16,32], index: 10, kind: input, shape index: {}]   ;;  %s824_s11 = inlined_call_operand.vmem [shape: f32[1,32], index: 11, kind: input, shape index: {}]   ;;  %s825_s12 = inlined_call_operand.vmem [shape: bf16[32,32], index: 12, kind: input, shape index: {}]   ;;  %s826_s13 = inlined_call_operand.vmem [shape: bf16[3,32], index: 13, kind: input, shape index: {}]   ;;  %s827_s14 = inlined_call_operand.vmem [shape: f32[1,32], index: 14, kind: input, shape index: {}]   ;;  %s828_s15 = inlined_call_operand.vmem [shape: bf16[1,32], index: 15, kind: input, shape index: {}]   ;;  %s829_s16 = inlined_call_operand.<no memory space> [shape: f32[1,1], index: 16, kind: input, shape index: {}]   ;;  %s830_s17 = inlined_call_operand.hbm [shape: f32[8,8], index: 17, kind: output, shape index: {0}]   ;;  %s831_s18 = inlined_call_operand.vmem [shape: f32[8,1], index: 18, kind: output, shape index: {1}]  }
   0x1   :  { %832 = sst [smem:[#allocation6_spill]] %s813_s0  ;;  %v24_v0 = vstv %s829_s16 }
   0x2   :  { %833 = sst [smem:[#allocation7_spill]] %s814_s1  ;;  %25 = vst [vmem:[#allocation2] sm:$0x1] %v24_v0 }
   0x3   :  { %834 = sst [smem:[#allocation8_spill]] %s815_s2 }
   0x4   :  { %v568_v1 = vld [vmem:[%s816_s3] sm:$0xff]   ;;  %v600_v2 = vmov 0.0   ;;  %s835_s1 = sld [smem:[#allocation6_spill]]  ;;  %vm82_vm0 = vcmask 130048   ;;  %vm601_vm1 = vmmov 0  }
   0x5   :  { %522 = vmatprep.subr.bf16.mxu0 %v600_v2  ;;  %528 = vmatprep.subr.bf16.mxu1 %v600_v2 }
   0x6   :  { %523 = vmatpush3.bf16.msra.mxu0 %v568_v1  ;;  %524 = vmatprep.mubr.msk.bf16.mxu0 %vm601_vm1, %v600_v2 }
   0x7   :  { %532 = vmatprep.mubr.msk.bf16.mxu1 %vm601_vm1, %v600_v2  ;;  %536 = vmatprep.subr.bf16.mxu0 %v600_v2 }
   0xa   :  { %v64_v3 = vld [vmem:[%s835_s1] sm:$0xf] }
   0xb   :  { %525 = vmatmul.mubr.msk.bf16.vlgmr.msra.gmra.mrb[0].mxu0 %vm82_vm0, %v64_v3 }
   0xc   :  { %540 = vmatprep.mubr.msk.bf16.mxu0 %vm601_vm1, %v600_v2 }
   0xd   :  { %26 = vsyncpa [#allocation4], 0  ;;  %v569_v4 = vld [vmem:[%s818_s5] sm:$0xff]   ;;  %v570_v5 = vld [vmem:[%s818_s5 + $0x8] sm:$0xff]   ;;  %s836_s23 = sld [smem:[#allocation7_spill]]  ;;  %v602_v7 = vmov 0   ;;  %v139_v20 = vlaneseq }
   0xe   :  { %529 = vmatpush3.bf16.msra.mxu1 %v569_v4  ;;  %564 = vset.pattern.permute.xlu0 %v602_v7  ;;  %v603_v9 = vmov 2   ;;  %v604_v10 = vmov 1   ;;  %v490_v11 = vld [vmem:[%s817_s4] ss:$0 sm:$0xff]  ;;  %vm178_vm2 = vcmask 261120   ;;  %v573_v41 = vld [vmem:[%s821_s8 + $0x8] sm:$0xff]  }
   0xf   :  { %530 = vmatprep.subr.bf16.mxu1 %v600_v2  ;;  %566 = vset.pattern.permute.xlu1 %v603_v9  ;;  %v571_v18 = vld [vmem:[%s823_s10] sm:$0xff]   ;;  %v140_v21 = vshrl.u32 %v139_v20, 7  ;;  %s837_s24 = sld [smem:[#allocation8_spill]]  ;;  %vm304_vm5 = vcmask 64512  }
  0x10   :  { %v367_v22 = vld [vmem:[%s826_s13] sm:$0x1]  ;;  %v380_v33 = vld [vmem:[%s826_s13] sm:$0x2] }
  0x11   :  { %v744_v23 = vsub.s32 0, %v140_v21  ;;  %v368_v24 = vunpack.c.l.bf16 %v367_v22  ;;  %v150_v25 = vsub.s32 1, %v140_v21  ;;  %v162_v34 = vsub.s32 2, %v140_v21  ;;  %v572_v40 = vld [vmem:[%s821_s8] sm:$0xff]  }
  0x12   :  { %531 = vmatpush3.bf16.msra.mxu1 %v570_v5  ;;  %v381_v35 = vunpack.c.l.bf16 %v380_v33  ;;  %537 = vmatpush3.bf16.msra.mxu0 %v572_v40  ;;  %v132_v42 = vld [vmem:[%s819_s6] sm:$0x1]  ;;  %v154_v44 = vld [vmem:[%s819_s6] sm:$0x2] }
  0x13   :  { %544 = vmatprep.subr.bf16.mxu1 %v600_v2  ;;  %v65_v6 = vld [vmem:[%s836_s23] sm:$0xf]  ;;  %v372_v26 = vrot.slane %v368_v24, %v744_v23  ;;  %v377_v28 = vrot.slane %v368_v24, %v150_v25  ;;  %538 = vmatprep.subr.bf16.mxu0 %v600_v2  ;;  %v133_v43 = vunpack.c.l.bf16 %v132_v42  ;;  %v155_v47 = vunpack.c.l.bf16 %v154_v44 }
  0x14   :  { %v66_v8 = vunpack.c.l.bf16 %v65_v6  ;;  %v385_v36 = vrot.slane %v381_v35, %v162_v34  ;;  %v496_v55 = vld [vmem:[%s820_s7] ss:$0 sm:$0xff]  ;;  %v575_v6 = vld [vmem:[%s825_s12 + $0x8] sm:$0xff]  }
  0x15   :  { %v142_v45 = vrot.slane %v133_v43, %v744_v23  ;;  %v151_v46 = vrot.slane %v133_v43, %v150_v25  ;;  %v163_v50 = vrot.slane %v155_v47, %v162_v34  ;;  %v501_v62 = vld [vmem:[%s824_s11] ss:$0 sm:$0xff] }
  0x16   :  { %136 = vperm.xlu0 %564, %v66_v8   ;;  %157 = vperm.xlu1 %566, %v66_v8   ;;  %v574_v63 = vld [vmem:[%s825_s12] sm:$0xff]  }
  0x17   :  { %539 = vmatpush3.bf16.msra.mxu0 %v573_v41  ;;  %v452_v20 = vld [vmem:[%s828_s15] sm:$0x1] }
  0x18   :  { %550 = vmatprep.subr.bf16.mxu0 %v600_v2  ;;  %v453_v21 = vunpack.c.l.bf16 %v452_v20  ;;  %v507_v22 = vld [vmem:[%s827_s14] ss:$0 sm:$0xff] }
  0x1a   :  { %565 = vset.pattern.permute.xlu0 %v604_v10 }
  0x1b   :  { %145 = vperm.xlu0 %565, %v66_v8  }
  0x1f   :  { %567 = vset.pattern.permute.xlu0 %v603_v9 }
  0x95   :  { %v137_v27 = vpop.permute.xlu0 %136  ;;  %v158_v37 = vpop.permute.xlu1 %157 }
  0x96   :  { %v373_v29 = vmul.f32 %v372_v26, %v137_v27  ;;  %v386_v38 = vmul.f32 %v385_v36, %v158_v37  ;;  %v143_v48 = vmul.f32 %v142_v45, %v137_v27  ;;  %v164_v52 = vmul.f32 %v163_v50, %v158_v37 }
  0x9a   :  { %v146_v30 = vpop.permute.xlu0 %145 }
  0x9b   :  { %v378_v31 = vmul.f32 %v377_v28, %v146_v30  ;;  %v152_v49 = vmul.f32 %v151_v46, %v146_v30 }
  0x9d   :  { %v379_v32 = vadd.f32 %v378_v31, %v373_v29  ;;  %v153_v51 = vadd.f32 %v152_v49, %v143_v48  ;;  %v457_v29 = vrot.slane %v453_v21, %v744_v23 }
  0x9f   :  { %v387_v39 = vadd.f32 %v386_v38, %v379_v32  ;;  %v165_v53 = vadd.f32 %v164_v52, %v153_v51 }
  0xde   :  { %v120_v12 = vpop.f32.mrb[0].mxu0 }
  0xdf   :  { %v121_v13 = vadd.f32 %v490_v11, %v120_v12  ;;  %v526_v14 = vpop.f32.mrb[1].mxu0  ;;  %v298_v11 = vld [vmem:[%s837_s24] sm:$0xf] }
  0xe0   :  { %v123_v15 = vpop.f32.mrb[2].mxu0  ;;  %vm299_vm3 = vcmp.gt.bf16.partialorder %v298_v11, 0  ;;  %v497_v14 = vld [vmem:[%s822_s9] ss:$0 sm:$0xff]  ;;  %s605_s9 = smov [#allocation3]  }
  0xe1   :  { %v126_v16 = vmax.f32 %v121_v13, 0.0  ;;  %v527_v17 = vpop.f32.mrb[3].mxu0  ;;  %v300_v12 = vsel %vm299_vm3, 65537, %v602_v7  ;;  %s478_s15 = sshll.u32 %s605_s9, 4  ;;  %s479_s15 = int_to_ptr.vmem [resolvable:$true] %s478_s15 }
  0xe2   :  { %v301_v13 = vunpack.c.l.b16 %v300_v12  ;;  %s576_s28 = scalar_lea.vmem %s479_s15, 128  ;;  %p581_p1 = scmp.lt.s32.totalorder %s479_s15, %s479_s15 }
  0xe3   :  { %v127_v19 = vpack.c.bf16 %v126_v16, %v126_v16  ;;  %p577_p0 = scmp.ne.s32.totalorder %s479_s15, %s576_s28  ;;  %p582_p2 = scmp.lt.s32.totalorder %s576_s28, %s576_s28 }
  0xe4   :  { %vm302_vm4 = vcmp.ne.s32.totalorder %v301_v13, 0 }
  0xe5   :  { %533 = vmatmul.mubr.msk.bf16.vlgmr.msra.gmra.mrb[0].mxu1 %vm178_vm2, %v127_v19  ;;  %p583_p3 = por %p582_p2, %p581_p1 }
  0xe6   :  { %545 = vmatpush3.bf16.msra.mxu1 %v571_v18  ;;  %546 = vmatprep.mubr.msk.bf16.mxu1 %vm601_vm1, %v600_v2 }
  0xe7   :  { %p584_p4 = pnand %p583_p3, %p577_p0 }
  0xed   :  { %547 = vmatmul.mubr.msk.bf16.vlgmr.msra.gmra.mrb[4].mxu1 %vm82_vm0, %v64_v3 }
 0x1b8   :  { %v216_v54 = vpop.f32.mrb[0].mxu1 }
 0x1b9   :  { %v217_v56 = vadd.f32 %v216_v54, %v165_v53  ;;  %v534_v57 = vpop.f32.mrb[1].mxu1 }
 0x1ba   :  { %v219_v58 = vpop.f32.mrb[2].mxu1 }
 0x1bb   :  { %v229_v59 = vadd.f32 %v496_v55, %v217_v56  ;;  %v535_v60 = vpop.f32.mrb[3].mxu1 }
 0x1bd   :  { %v230_v61 = vmax.f32 %v229_v59, 0.0 }
 0x1bf   :  { %v231_v0 = vpack.c.bf16 %v230_v61, %v230_v61 }
 0x1c0   :  { %v355_v1 = vpop.f32.mrb[4].mxu1 }
 0x1c1   :  { %v356_v3 = vadd.f32 %v501_v62, %v355_v1  ;;  %541 = vmatmul.mubr.msk.bf16.vlgmr.msra.gmra.mrb[4].mxu0 %vm178_vm2, %v231_v0  ;;  %v548_v4 = vpop.f32.mrb[5].mxu1 }
 0x1c2   :  { %551 = vmatpush3.bf16.msra.mxu0 %v574_v63  ;;  %v358_v5 = vpop.f32.mrb[6].mxu1  ;;  %554 = vmatprep.mubr.msk.bf16.mxu0 %vm601_vm1, %v600_v2 }
 0x1c3   :  { %v361_v8 = vmax.f32 %v356_v3, 0.0  ;;  %v549_v9 = vpop.f32.mrb[7].mxu1  ;;  %552 = vmatprep.subr.bf16.mxu0 %v600_v2 }
 0x1c5   :  { %v362_v10 = vpack.c.bf16 %v361_v8, %v361_v8 }
 0x1c6   :  { %553 = vmatpush3.bf16.msra.mxu0 %v575_v6 }
 0x1c9   :  { %555 = vmatmul.mubr.msk.bf16.vlgmr.msra.gmra.mrb[8].mxu0 %vm178_vm2, %v362_v10 }
 0x294   :  { %v292_v15 = vpop.f32.mrb[4].mxu0 }
 0x295   :  { %v293_v16 = vadd.f32 %v497_v14, %v292_v15  ;;  %v542_v2 = vpop.f32.mrb[5].mxu0 }
 0x296   :  { %v295_v17 = vpop.f32.mrb[6].mxu0 }
 0x297   :  { %v303_v18 = vsel %vm302_vm4, %v293_v16, -1e+10  ;;  %v543_v19 = vpop.f32.mrb[7].mxu0 }
 0x298   :  { %305 = vst.msk [vmem:[#allocation3] sm:$0xff] %vm304_vm5, %v303_v18 }
 0x29c   :  { %v437_v7 = vpop.f32.mrb[8].mxu0 }
 0x29d   :  { %v438_v24 = vadd.f32 %v437_v7, %v387_v39  ;;  %v556_v25 = vpop.f32.mrb[9].mxu0 }
 0x29e   :  { %v440_v26 = vpop.f32.mrb[10].mxu0 }
 0x29f   :  { %v450_v27 = vadd.f32 %v507_v22, %v438_v24  ;;  %v557_v28 = vpop.f32.mrb[11].mxu0 }
 0x2a1   :  { %v451_v30 = vmax.f32 %v450_v27, 0.0 }
 0x2a3   :  { %v458_v31 = vmul.f32 %v457_v29, %v451_v30 }
 0x2a5   :  { %v459_v32 = vsel %vm178_vm2, %v458_v31, 0.0 }
 0x2a6   :  { %460 = vadd.xlane.f32.xlu1 %v459_v32 }
 0x2a7   :  { %587 = shalt.err (!%p584_p4)
}
 0x2a8   :  { %s588_s30 = scalar_lea.hbm %s830_s17, 128 }
 0x2a9   :  { %p589_p5 = scmp.ne.s32.totalorder %s830_s17, %s588_s30  ;;  %p592_p6 = scmp.lt.u32.totalorder %s588_s30, %s830_s17 }
 0x2ab   :  { %p594_p7 = pnand %p592_p6, %p589_p5 }
 0x2ad   :  { %597 = shalt.err (!%p594_p7)
}
 0x2ae   :  { %481 = dma.vmem_to_hbm [thread:$0]  %s479_s15, 128, %s830_s17, [#allocation4]   ;;  %v508_v23 = vld [vmem:[#allocation2] ss:$0 sm:$0xff]  ;;  %vm470_vm6 = vcmask 7168  }
 0x333   :  { %v461_v33 = vpop.xlane.xlu1 %460 }
 0x334   :  { %v469_v34 = vadd.f32 %v508_v23, %v461_v33 }
 0x336   :  { %471 = vst.msk [vmem:[%s831_s18] sm:$0xff] %vm470_vm6, %v469_v34 }
 0x337   :  { %598 = dma.done.wait [#allocation4], 128  }
 0x338   :  { %599 = vsyncadd [#allocation4], 4294967168 }
 0x339   :  { %489 = vsyncpa [#allocation4], 1 }

</bundles_post_ra>
